<compile_context>
chip_gen: v7x
topology: tpu7x:2x2x1
jax: 0.10.0
libtpu: 0.0.40
codegen_flags: <defaults>
</compile_context>

<pallas_src>
import functools

import jax
import jax.numpy as jnp
from jax.experimental import pallas as pl
from jax.experimental.pallas import tpu as pltpu


def _round_up(x, m):
    return (x + m - 1) // m * m


def _vmem_budgets():
    """(per-image-stream-buffer budget, explicit vmem_limit_bytes) per TPU gen."""
    kind = ""
    try:
        kind = jax.devices()[0].device_kind.lower()
    except Exception:
        pass
    # 128-MiB-VMEM parts (v5e / v6e): larger steps amortize ~0.35us/step.
    if ("v5" in kind) or ("v6" in kind):
        return 24 * 1024 * 1024, 80 * 1024 * 1024
    # v7x (64 MiB per TC) and unknown chips: stay conservative.
    return 16 * 1024 * 1024, 48 * 1024 * 1024


def _pick_images_per_block(B, C, budget, itemsize=4):
    """Images per row-block.

    Constraints: the output block's second-to-last dim (= images per block)
    must be a multiple of 8 or the full batch, which also makes the image
    row-block (images*C rows) legal.  Prefer >= 2 batch blocks so v7x's two
    TensorCores both stream (v5e/v6e are single-TC, no cost there).
    """
    cands = [n for n in range(1, B + 1) if B % n == 0 and (n % 8 == 0 or n == B)]

    def fits(n):  # padded rows x minimal (128-lane) tile must fit the budget
        return _round_up(n * C, 8) * 128 * itemsize <= budget

    multi = [n for n in cands if B // n >= 2 and fits(n)]
    if multi:
        return max(multi)
    fitting = [n for n in cands if fits(n)]
    if fitting:
        return max(fitting)
    return min(cands)


def _pick_hw_tile(HW_pad, rows_pad, itemsize, budget, max_lane_groups=512):
    """Largest multiple of 128 dividing HW_pad whose PADDED block fits budget."""
    best = 128
    t = 128
    while t <= HW_pad:
        if (HW_pad % t == 0
                and rows_pad * t * itemsize <= budget
                and t // 128 <= max_lane_groups):
            best = t
        t += 128
    return best


def merge_model_kernel(
    img_ref,            # (R_TILE, HW_TILE)  rows = image*C channels, HW lane-dense
    sel_ref,            # (BM, R_TILE)       0/1 row->image selection (per block)
    whr_ref,            # (R_TILE, 8)        fused MASK|GENDER|AGE weights, tiled per image
    bh_ref,             # (1, 8)
    w1_ref, b1_ref,     # (8, 32), (1, 32)
    w2_ref, b2_ref,     # (32, 18), (1, 18)
    out_ref,            # (BM, 18)
    acc_ref,            # VMEM scratch (R_TILE, 128) f32: per-lane partial sums
    *, inv_hw, lane_groups,
):
    h = pl.program_id(1)

    @pl.when(h == 0)
    def _():
        acc_ref[...] = jnp.zeros_like(acc_ref)

    # Per-step reduction: fold the HW tile's 128-lane groups with plain VPU
    # adds only (no per-step XLU cross-lane reduce, no narrow masked store).
    x = img_ref[...].astype(jnp.float32)
    part = x[:, :128]
    for g in range(1, lane_groups):
        part = part + x[:, g * 128:(g + 1) * 128]
    acc_ref[...] += part

    @pl.when(h == pl.num_programs(1) - 1)
    def _():
        # Single cross-lane reduce + scale by 1/(true H*W) in the epilogue.
        row_sum = jnp.sum(acc_ref[...], axis=-1, keepdims=True)      # (R_TILE, 1)
        pooled_w = (row_sum * inv_hw) * whr_ref[...]                 # (R_TILE, 8)

        # merged[b, j] = sum_c pooled[b, c] * W_heads[c, j]  (fused 3-head cat)
        merged = jnp.dot(sel_ref[...], pooled_w,
                         preferred_element_type=jnp.float32) + bh_ref[...]
        merged = jnp.maximum(merged, 0.0)                            # (BM, 8)

        hid = jnp.dot(merged, w1_ref[...],
                      preferred_element_type=jnp.float32) + b1_ref[...]
        hid = jnp.maximum(hid, 0.0)                                  # (BM, 32)
        out = jnp.dot(hid, w2_ref[...],
                      preferred_element_type=jnp.float32) + b2_ref[...]
        out_ref[...] = out.astype(out_ref.dtype)                     # (BM, 18)


def multi_model_merge_forward(image_nchw, params):
    """image_nchw: (B, C, H, W) float32. Returns (B, 18) logits."""
    B, C, H, W = image_nchw.shape
    HW = H * W
    HW_pad = _round_up(HW, 128)
    R = B * C

    # Free contiguous view of NCHW; HW sits on the lane axis.
    img = image_nchw.reshape(R, HW)
    if HW_pad != HW:
        # Zero-padding is exact: the mean divides by the TRUE H*W below.
        img = jnp.pad(img, ((0, 0), (0, HW_pad - HW)))

    (w_mask, b_mask, w_gen, b_gen, w_age, b_age, w1, b1, w2, b2) = params
    w_heads = jnp.concatenate([w_mask, w_gen, w_age], axis=1)        # (C, 8)
    b_heads = jnp.concatenate([b_mask, b_gen, b_age], axis=1)        # (1, 8)
    num_classes = w2.shape[1]

    img_budget, vmem_limit = _vmem_budgets()
    bm_imgs = _pick_images_per_block(B, C, img_budget, img.dtype.itemsize)
    R_TILE = bm_imgs * C
    rows_pad = _round_up(R_TILE, 8)          # padded sublane footprint of the block
    HW_TILE = _pick_hw_tile(HW_pad, rows_pad, img.dtype.itemsize, img_budget)
    lane_groups = HW_TILE // 128
    grid = (R // R_TILE, HW_pad // HW_TILE)

    # Per-block constants: same for every row block (rows are b*C + c).
    sel = jnp.repeat(jnp.eye(bm_imgs, dtype=jnp.float32), C, axis=1)  # (BM, R_TILE)
    wh_rep = jnp.tile(w_heads, (bm_imgs, 1))                          # (R_TILE, 8)

    def full_spec(arr):
        nd = arr.ndim
        return pl.BlockSpec(arr.shape, lambda b, h, _nd=nd: (0,) * _nd)

    kernel = functools.partial(
        merge_model_kernel, inv_hw=1.0 / float(HW), lane_groups=lane_groups)

    itemsize = img.dtype.itemsize
    bytes_accessed = R * HW_pad * itemsize + B * num_classes * 4 + (
        sel.size + wh_rep.size + b_heads.size + w1.size + b1.size
        + w2.size + b2.size) * 4
    flops = R * HW_pad + 2 * B * (C * 8 + 8 * 32 + 32 * num_classes)

    return pl.pallas_call(
        kernel,
        out_shape=jax.ShapeDtypeStruct((B, num_classes), jnp.float32),
        grid_spec=pltpu.PrefetchScalarGridSpec(
            num_scalar_prefetch=0,
            grid=grid,
            in_specs=[
                # Image: lane-dense HW tile, row (image*channel) blocked.
                pl.BlockSpec((R_TILE, HW_TILE), lambda b, h: (b, h)),
                full_spec(sel), full_spec(wh_rep), full_spec(b_heads),
                full_spec(w1), full_spec(b1),
                full_spec(w2), full_spec(b2),
            ],
            out_specs=pl.BlockSpec((bm_imgs, num_classes), lambda b, h: (b, 0)),
            scratch_shapes=[pltpu.VMEM((R_TILE, 128), jnp.float32)],
        ),
        compiler_params=pltpu.CompilerParams(
            # batch/row blocks are independent (v7x megacore-shardable);
            # the HW reduction axis is last and sequential.
            dimension_semantics=("parallel", "arbitrary"),
            vmem_limit_bytes=vmem_limit,
        ),
        cost_estimate=pl.CostEstimate(
            flops=int(flops), transcendentals=0,
            bytes_accessed=int(bytes_accessed)),
    )(img, sel, wh_rep, b_heads, w1, b1, w2, b2)


def make_params(key, C, concatclasses=8, num_classes=18):
    """Deterministic synthetic parameters (no checkpoint loading)."""
    n_mask, n_gender, n_age = 3, 2, 3
    assert n_mask + n_gender + n_age == concatclasses
    ks = jax.random.split(key, 10)
    scale = 0.1
    wm = scale * jax.random.normal(ks[0], (C, n_mask), jnp.float32)
    bm = scale * jax.random.normal(ks[1], (1, n_mask), jnp.float32)
    wg = scale * jax.random.normal(ks[2], (C, n_gender), jnp.float32)
    bg = scale * jax.random.normal(ks[3], (1, n_gender), jnp.float32)
    wa = scale * jax.random.normal(ks[4], (C, n_age), jnp.float32)
    ba = scale * jax.random.normal(ks[5], (1, n_age), jnp.float32)
    w1 = scale * jax.random.normal(ks[6], (concatclasses, 32), jnp.float32)
    b1 = scale * jax.random.normal(ks[7], (1, 32), jnp.float32)
    w2 = scale * jax.random.normal(ks[8], (32, num_classes), jnp.float32)
    b2 = scale * jax.random.normal(ks[9], (1, num_classes), jnp.float32)
    return (wm, bm, wg, bg, wa, ba, w1, b1, w2, b2)


def _reference_forward(image_nchw, params):
    """Pure-JAX reference mirroring the PyTorch forward."""
    wm, bm, wg, bg, wa, ba, w1, b1, w2, b2 = params
    pooled = jnp.mean(image_nchw, axis=(2, 3))          # (B, C)
    mask = pooled @ wm + bm
    gender = pooled @ wg + bg
    age = pooled @ wa + ba
    merged = jnp.concatenate([mask, gender, age], axis=1)
    merged = jnp.maximum(merged, 0.0)
    h = jnp.maximum(merged @ w1 + b1, 0.0)
    return h @ w2 + b2


if __name__ == "__main__":
    key = jax.random.PRNGKey(0)
    k_img, k_par = jax.random.split(key)

    B, C, H, W = 2, 4, 16, 16
    image = jax.random.normal(k_img, (B, C, H, W), jnp.float32)
    params = make_params(k_par, C)

    out = multi_model_merge_forward(image, params)
    out = jax.block_until_ready(out)

    ref = _reference_forward(image, params)
    assert out.shape == (B, 18), out.shape
    assert jnp.allclose(out, ref, atol=1e-4, rtol=1e-4), "mismatch vs reference"

    print("KERNEL_OK")
</pallas_src>

<mosaic_0001>
module attributes {stable_mosaic.version = 11 : i64} {
  func.func @merge_model_kernel(%arg0: i32, %arg1: i32, %arg2: memref<8x256xf32, #tpu.memory_space<vmem>>, %arg3: memref<2x8xf32, #tpu.memory_space<vmem>>, %arg4: memref<8x8xf32, #tpu.memory_space<vmem>>, %arg5: memref<1x8xf32, #tpu.memory_space<vmem>>, %arg6: memref<8x32xf32, #tpu.memory_space<vmem>>, %arg7: memref<1x32xf32, #tpu.memory_space<vmem>>, %arg8: memref<32x18xf32, #tpu.memory_space<vmem>>, %arg9: memref<1x18xf32, #tpu.memory_space<vmem>>, %arg10: memref<2x18xf32, #tpu.memory_space<vmem>>, %arg11: memref<8x128xf32, #tpu.memory_space<vmem>>) attributes {dimension_semantics = [#tpu.dimension_semantics<parallel>, #tpu.dimension_semantics<arbitrary>], iteration_bounds = array<i64: 1, 1>, scalar_prefetch = 0 : i64, scratch_operands = 1 : i64, tpu.core_type = #tpu.core_type<tc>, window_params = [{transform_indices = @transform_0, window_bounds = array<i64: 8, 256>}, {pipeline_mode = #tpu.pipeline_mode<synchronous>, transform_indices = @transform_1, window_bounds = array<i64: 2, 8>}, {pipeline_mode = #tpu.pipeline_mode<synchronous>, transform_indices = @transform_2, window_bounds = array<i64: 8, 8>}, {pipeline_mode = #tpu.pipeline_mode<synchronous>, transform_indices = @transform_3, window_bounds = array<i64: 1, 8>}, {pipeline_mode = #tpu.pipeline_mode<synchronous>, transform_indices = @transform_4, window_bounds = array<i64: 8, 32>}, {pipeline_mode = #tpu.pipeline_mode<synchronous>, transform_indices = @transform_5, window_bounds = array<i64: 1, 32>}, {pipeline_mode = #tpu.pipeline_mode<synchronous>, transform_indices = @transform_6, window_bounds = array<i64: 32, 18>}, {pipeline_mode = #tpu.pipeline_mode<synchronous>, transform_indices = @transform_7, window_bounds = array<i64: 1, 18>}, {transform_indices = @transform_8, window_bounds = array<i64: 2, 18>}]} {
    %c0_i32 = arith.constant 0 : i32
    %0 = arith.cmpi eq, %arg1, %c0_i32 : i32
    %1 = arith.extui %0 : i1 to i32
    %c0_i32_0 = arith.constant 0 : i32
    %2 = arith.cmpi ne, %1, %c0_i32_0 : i32
    scf.if %2 {
      %cst = arith.constant 0.000000e+00 : f32
      %13 = vector.broadcast %cst : f32 to vector<8x128xf32>
      %c0_8 = arith.constant 0 : index
      %c0_9 = arith.constant 0 : index
      %14 = vector.load %arg11[%c0_8, %c0_9] : memref<8x128xf32, #tpu.memory_space<vmem>>, vector<8x128xf32>
      tpu.vector_store %arg11[%c0_8, %c0_9], %13 {strides = array<i32>} : memref<8x128xf32, #tpu.memory_space<vmem>>, vector<8x128xf32>,
    } else {
    }
    %c0 = arith.constant 0 : index
    %c0_1 = arith.constant 0 : index
    %3 = vector.load %arg2[%c0, %c0_1] : memref<8x256xf32, #tpu.memory_space<vmem>>, vector<8x256xf32>
    %4 = vector.extract_strided_slice %3 {offsets = [0, 0], sizes = [8, 128], strides = [1, 1]} : vector<8x256xf32> to vector<8x128xf32>
    %5 = vector.extract_strided_slice %3 {offsets = [0, 128], sizes = [8, 128], strides = [1, 1]} : vector<8x256xf32> to vector<8x128xf32>
    %6 = arith.addf %4, %5 : vector<8x128xf32>
    %c0_2 = arith.constant 0 : index
    %c0_3 = arith.constant 0 : index
    %7 = vector.load %arg11[%c0_2, %c0_3] : memref<8x128xf32, #tpu.memory_space<vmem>>, vector<8x128xf32>
    %8 = arith.addf %7, %6 : vector<8x128xf32>
    %c0_4 = arith.constant 0 : index
    %c0_5 = arith.constant 0 : index
    %9 = vector.load %arg11[%c0_4, %c0_5] : memref<8x128xf32, #tpu.memory_space<vmem>>, vector<8x128xf32>
    tpu.vector_store %arg11[%c0_4, %c0_5], %8 {strides = array<i32>} : memref<8x128xf32, #tpu.memory_space<vmem>>, vector<8x128xf32>,
    %c0_i32_6 = arith.constant 0 : i32
    %10 = arith.cmpi eq, %arg1, %c0_i32_6 : i32
    %11 = arith.extui %10 : i1 to i32
    %c0_i32_7 = arith.constant 0 : i32
    %12 = arith.cmpi ne, %11, %c0_i32_7 : i32
    scf.if %12 {
      %c0_8 = arith.constant 0 : index
      %c0_9 = arith.constant 0 : index
      %13 = vector.load %arg11[%c0_8, %c0_9] : memref<8x128xf32, #tpu.memory_space<vmem>>, vector<8x128xf32>
      %cst = arith.constant dense<0.000000e+00> : vector<8xf32>
      %14 = vector.multi_reduction <add>, %13, %cst [1] : vector<8x128xf32> to vector<8xf32>
      %15 = vector.shape_cast %14 : vector<8xf32> to vector<8x1xf32>
      %cst_10 = arith.constant 3.906250e-03 : f32
      %16 = vector.broadcast %cst_10 : f32 to vector<8x1xf32>
      %17 = arith.mulf %15, %16 : vector<8x1xf32>
      %c0_11 = arith.constant 0 : index
      %c0_12 = arith.constant 0 : index
      %18 = vector.load %arg4[%c0_11, %c0_12] : memref<8x8xf32, #tpu.memory_space<vmem>>, vector<8x8xf32>
      %19 = vector.broadcast %17 : vector<8x1xf32> to vector<8x8xf32>
      %20 = arith.mulf %19, %18 : vector<8x8xf32>
      %c0_13 = arith.constant 0 : index
      %c0_14 = arith.constant 0 : index
      %21 = vector.load %arg3[%c0_13, %c0_14] : memref<2x8xf32, #tpu.memory_space<vmem>>, vector<2x8xf32>
      %cst_15 = arith.constant dense<0.000000e+00> : vector<2x8xf32>
      %22 = tpu.matmul %21, %20, %cst_15 {dimension_numbers = #tpu.dot_dimension_numbers<[1], [0], [0], [1], [0, 0, 1, 1], [], []>} : vector<2x8xf32>, vector<8x8xf32>, vector<2x8xf32> -> vector<2x8xf32>
      %c0_16 = arith.constant 0 : index
      %c0_17 = arith.constant 0 : index
      %23 = vector.load %arg5[%c0_16, %c0_17] : memref<1x8xf32, #tpu.memory_space<vmem>>, vector<1x8xf32>
      %24 = vector.broadcast %23 : vector<1x8xf32> to vector<2x8xf32>
      %25 = arith.addf %22, %24 : vector<2x8xf32>
      %cst_18 = arith.constant 0.000000e+00 : f32
      %26 = vector.broadcast %cst_18 : f32 to vector<2x8xf32>
      %27 = arith.maximumf %25, %26 : vector<2x8xf32>
      %c0_19 = arith.constant 0 : index
      %c0_20 = arith.constant 0 : index
      %28 = vector.load %arg6[%c0_19, %c0_20] : memref<8x32xf32, #tpu.memory_space<vmem>>, vector<8x32xf32>
      %cst_21 = arith.constant dense<0.000000e+00> : vector<2x32xf32>
      %29 = tpu.matmul %27, %28, %cst_21 {dimension_numbers = #tpu.dot_dimension_numbers<[1], [0], [0], [1], [0, 0, 1, 1], [], []>} : vector<2x8xf32>, vector<8x32xf32>, vector<2x32xf32> -> vector<2x32xf32>
      %c0_22 = arith.constant 0 : index
      %c0_23 = arith.constant 0 : index
      %30 = vector.load %arg7[%c0_22, %c0_23] : memref<1x32xf32, #tpu.memory_space<vmem>>, vector<1x32xf32>
      %31 = vector.broadcast %30 : vector<1x32xf32> to vector<2x32xf32>
      %32 = arith.addf %29, %31 : vector<2x32xf32>
      %cst_24 = arith.constant 0.000000e+00 : f32
      %33 = vector.broadcast %cst_24 : f32 to vector<2x32xf32>
      %34 = arith.maximumf %32, %33 : vector<2x32xf32>
      %c0_25 = arith.constant 0 : index
      %c0_26 = arith.constant 0 : index
      %35 = vector.load %arg8[%c0_25, %c0_26] : memref<32x18xf32, #tpu.memory_space<vmem>>, vector<32x18xf32>
      %cst_27 = arith.constant dense<0.000000e+00> : vector<2x18xf32>
      %36 = tpu.matmul %34, %35, %cst_27 {dimension_numbers = #tpu.dot_dimension_numbers<[1], [0], [0], [1], [0, 0, 1, 1], [], []>} : vector<2x32xf32>, vector<32x18xf32>, vector<2x18xf32> -> vector<2x18xf32>
      %c0_28 = arith.constant 0 : index
      %c0_29 = arith.constant 0 : index
      %37 = vector.load %arg9[%c0_28, %c0_29] : memref<1x18xf32, #tpu.memory_space<vmem>>, vector<1x18xf32>
      %38 = vector.broadcast %37 : vector<1x18xf32> to vector<2x18xf32>
      %39 = arith.addf %36, %38 : vector<2x18xf32>
      %c0_30 = arith.constant 0 : index
      %c0_31 = arith.constant 0 : index
      %40 = vector.load %arg10[%c0_30, %c0_31] : memref<2x18xf32, #tpu.memory_space<vmem>>, vector<2x18xf32>
      tpu.vector_store %arg10[%c0_30, %c0_31], %39 {strides = array<i32>} : memref<2x18xf32, #tpu.memory_space<vmem>>, vector<2x18xf32>,
    } else {
    }
    return
  }
  func.func @transform_0(%arg0: i32, %arg1: i32) -> (i32, i32) {
    %c0_i32 = arith.constant 0 : i32
    return %arg0, %arg1 : i32, i32
  }
  func.func @transform_1(%arg0: i32, %arg1: i32) -> (i32, i32) {
    %c0_i32 = arith.constant 0 : i32
    %c0_i32_0 = arith.constant 0 : i32
    %c0_i32_1 = arith.constant 0 : i32
    return %c0_i32, %c0_i32_0 : i32, i32
  }
  func.func @transform_2(%arg0: i32, %arg1: i32) -> (i32, i32) {
    %c0_i32 = arith.constant 0 : i32
    %c0_i32_0 = arith.constant 0 : i32
    %c0_i32_1 = arith.constant 0 : i32
    return %c0_i32, %c0_i32_0 : i32, i32
  }
  func.func @transform_3(%arg0: i32, %arg1: i32) -> (i32, i32) {
    %c0_i32 = arith.constant 0 : i32
    %c0_i32_0 = arith.constant 0 : i32
    %c0_i32_1 = arith.constant 0 : i32
    return %c0_i32, %c0_i32_0 : i32, i32
  }
  func.func @transform_4(%arg0: i32, %arg1: i32) -> (i32, i32) {
    %c0_i32 = arith.constant 0 : i32
    %c0_i32_0 = arith.constant 0 : i32
    %c0_i32_1 = arith.constant 0 : i32
    return %c0_i32, %c0_i32_0 : i32, i32
  }
  func.func @transform_5(%arg0: i32, %arg1: i32) -> (i32, i32) {
    %c0_i32 = arith.constant 0 : i32
    %c0_i32_0 = arith.constant 0 : i32
    %c0_i32_1 = arith.constant 0 : i32
    return %c0_i32, %c0_i32_0 : i32, i32
  }
  func.func @transform_6(%arg0: i32, %arg1: i32) -> (i32, i32) {
    %c0_i32 = arith.constant 0 : i32
    %c0_i32_0 = arith.constant 0 : i32
    %c0_i32_1 = arith.constant 0 : i32
    return %c0_i32, %c0_i32_0 : i32, i32
  }
  func.func @transform_7(%arg0: i32, %arg1: i32) -> (i32, i32) {
    %c0_i32 = arith.constant 0 : i32
    %c0_i32_0 = arith.constant 0 : i32
    %c0_i32_1 = arith.constant 0 : i32
    return %c0_i32, %c0_i32_0 : i32, i32
  }
  func.func @transform_8(%arg0: i32, %arg1: i32) -> (i32, i32) {
    %c0_i32 = arith.constant 0 : i32
    %c0_i32_0 = arith.constant 0 : i32
    return %arg0, %c0_i32 : i32, i32
  }
}

</mosaic_0001>

<bundles_post_ra>
// kernel: tpu_custom_call.1
= control target key start
LH: loop header
LB: loop body
LE: loop exit
PB: predicated region body
PF: predicated region fallthrough
CT: control target
= control target key end

     0   :  { %s485_s0 = inlined_call_operand.vmem [shape: f32[8,256], index: 0, kind: input, shape index: {}]   ;;  %s486_s1 = inlined_call_operand.vmem [shape: f32[2,8], index: 1, kind: input, shape index: {}]   ;;  %s487_s2 = inlined_call_operand.vmem [shape: f32[8,8], index: 2, kind: input, shape index: {}]   ;;  %s488_s3 = inlined_call_operand.vmem [shape: f32[1,8], index: 3, kind: input, shape index: {}]   ;;  %s489_s4 = inlined_call_operand.vmem [shape: f32[8,32], index: 4, kind: input, shape index: {}]   ;;  %s490_s5 = inlined_call_operand.vmem [shape: f32[1,32], index: 5, kind: input, shape index: {}]   ;;  %s491_s6 = inlined_call_operand.vmem [shape: f32[32,18], index: 6, kind: input, shape index: {}]   ;;  %s492_s7 = inlined_call_operand.vmem [shape: f32[1,18], index: 7, kind: input, shape index: {}]   ;;  %s493_s8 = inlined_call_operand.hbm [shape: f32[2,18], index: 8, kind: output, shape index: {}]  }
   0x1   :  { %v35_v0 = vld [vmem:[%s485_s0] sm:$0xff]  ;;  %v36_v1 = vld [vmem:[%s485_s0 + $0x8] sm:$0xff] }
   0x2   :  { %13 = vsyncpa [#allocation4], 0  ;;  %v37_v2 = vadd.f32 %v36_v1, %v35_v0  ;;  %v386_v3 = vmov 0.0   ;;  %vm387_vm0 = vmmov 0   ;;  %v48_v5 = vld [vmem:[%s487_s2] sm:$0xff]  ;;  %vm58_vm1 = vcmask 64512  }
   0x3   :  { %331 = vmatprep.subr.mxu1 %v386_v3  ;;  %333 = vmatprep.mubr.msk.f32.mxu1 %vm387_vm0, %v386_v3  ;;  %v50_v8 = vld [vmem:[%s486_s1] sm:$0x3]  ;;  %v216_v11 = vld [vmem:[%s491_s6 + $0x8] sm:$0xff]  ;;  %v388_v12 = vmov 0.0|0.0   ;;  %v217_v19 = vld [vmem:[%s491_s6 + $0x10] sm:$0xff]  ;;  %vm226_vm2 = vcmask 261120  }
   0x4   :  { %45 = vadd.xlane.f32.xlu0 %v37_v2  ;;  %349 = vmatprep.mubr.msk.f32.mxu0 %vm387_vm0, %v386_v3  ;;  %v133_v9 = vld [vmem:[%s489_s4] sm:$0xff]  ;;  %v218_v20 = vld [vmem:[%s491_s6 + $0x18] sm:$0xff]  ;;  %s389_s24 = smov [#allocation3]   ;;  %vm300_vm3 = vcmask 140288  }
   0x5   :  { %v215_v10 = vld [vmem:[%s491_s6] sm:$0xff]  ;;  %352 = vmatprep.subr.bf16.mxu0 %v388_v12  ;;  %v356_v21 = vpack.c.bf16 %v218_v20, %v217_v19  ;;  %s308_s25 = sshll.u32 %s389_s24, 4  ;;  %s309_s25 = int_to_ptr.vmem [resolvable:$true] %s308_s25 }
   0x6   :  { %v353_v13 = vpack.c.bf16 %v216_v11, %v215_v10  ;;  %v316_v14 = vld [vmem:[%s488_s3] ss:$0 sm:$0xff]  ;;  %s362_s6 = scalar_lea.vmem %s309_s25, 32  ;;  %p367_p1 = scmp.lt.s32.totalorder %s309_s25, %s309_s25 }
   0x7   :  { %v318_v22 = vld [vmem:[%s490_s5] ss:$0 sm:$0xff]  ;;  %p363_p0 = scmp.ne.s32.totalorder %s309_s25, %s362_s6  ;;  %p368_p2 = scmp.lt.s32.totalorder %s362_s6, %s362_s6 }
   0x8   :  { %354 = vmatpush3.bf16.msra.mxu0 %v353_v13  ;;  %v320_v27 = vld [vmem:[%s492_s7] ss:$0 sm:$0xff] }
   0x9   :  { %355 = vmatprep.subr.bf16.mxu0 %v388_v12  ;;  %p369_p3 = por %p368_p2, %p367_p1 }
   0xb   :  { %p370_p4 = pnand %p369_p3, %p363_p0 }
   0xc   :  { %357 = vmatpush3.bf16.msra.mxu0 %v356_v21 }
  0x91   :  { %v46_v4 = vpop.xlane.xlu0 %45 }
  0x92   :  { %v47_v6 = vmul.f32 0.00390625, %v46_v4 }
  0x94   :  { %v49_v7 = vmul.f32 %v48_v5, %v47_v6 }
  0x96   :  { %332 = vmatpush3.msra.mxu1 %v49_v7 }
  0x97   :  { %334 = vmatmul.mubr.msk.f32.vlgmr.msra.gmra.mrb[0].mxu1 %vm58_vm1, %v50_v8  ;;  %336 = vmatprep.subr.mxu1 %v386_v3 }
  0x98   :  { %338 = vmatprep.mubr.msk.f32.mxu1 %vm387_vm0, %v386_v3  ;;  %337 = vmatpush3.msra.mxu1 %v133_v9 }
 0x16a   :  { %v128_v15 = vpop.f32.mrb[0].mxu1 }
 0x16b   :  { %v129_v16 = vadd.f32 %v316_v14, %v128_v15  ;;  %v335_v17 = vpop.f32.mrb[1].mxu1 }
 0x16d   :  { %v132_v18 = vmax.f32 %v129_v16, 0.0 }
 0x16f   :  { %339 = vmatmul.mubr.msk.f32.vlgmr.msra.gmra.mrb[2].mxu1 %vm58_vm1, %v132_v18 }
 0x242   :  { %v210_v23 = vpop.f32.mrb[2].mxu1 }
 0x243   :  { %v211_v24 = vadd.f32 %v318_v22, %v210_v23  ;;  %v340_v25 = vpop.f32.mrb[3].mxu1 }
 0x245   :  { %v214_v26 = vmax.f32 %v211_v24, 0.0 }
 0x247   :  { %350 = vmatmul.mubr.msk.f32.vlgmr.msra.gmra.mrb[0].mxu0 %vm226_vm2, %v214_v26 }
 0x31a   :  { %v296_v28 = vpop.f32.mrb[0].mxu0 }
 0x31b   :  { %v297_v29 = vadd.f32 %v320_v27, %v296_v28  ;;  %v351_v30 = vpop.f32.mrb[1].mxu0 }
 0x31d   :  { %301 = vst.msk [vmem:[#allocation3] sm:$0x3] %vm300_vm3, %v297_v29 }
 0x31e   :  { %373 = shalt.err (!%p370_p4)
}
 0x31f   :  { %s374_s27 = scalar_lea.hbm %s493_s8, 32 }
 0x320   :  { %p375_p5 = scmp.ne.s32.totalorder %s493_s8, %s374_s27  ;;  %p378_p6 = scmp.lt.u32.totalorder %s374_s27, %s493_s8 }
 0x322   :  { %p380_p7 = pnand %p378_p6, %p375_p5 }
 0x324   :  { %383 = shalt.err (!%p380_p7)
}
 0x325   :  { %311 = dma.vmem_to_hbm [thread:$0]  %s309_s25, 32, %s493_s8, [#allocation4]  }
 0x326   :  { %384 = dma.done.wait [#allocation4], 32  }
 0x327   :  { %385 = vsyncadd [#allocation4], 4294967264 }
 0x328   :  { %315 = vsyncpa [#allocation4], 1 }

</bundles_post_ra>
